<compile_context>
chip_gen: v7x
topology: tpu7x:2x2x1
jax: 0.10.0
libtpu: 0.0.40
codegen_flags: <defaults>
</compile_context>

<pallas_src>
import functools
import numpy as np
import jax
import jax.numpy as jnp
from jax.experimental import pallas as pl
from jax.experimental.pallas import tpu as pltpu

DTYPE = jnp.bfloat16
_ROW_TILE_CAP = 16                    # max output rows per tile (re-derive per generation)
_ROW_TILE_BYTES = 2 * 1024 * 1024     # byte budget for one activation row-tile
_VMEM_LIMIT = 48 * 1024 * 1024        # leaves headroom inside v7x's 64 MiB VMEM

_PHASES = ((0, 0), (0, 1), (1, 0), (1, 1))


def _pick_rows(h, row_bytes, *, min_rows=1, cap=_ROW_TILE_CAP):
    """Largest divisor of `h` that keeps a row-tile under the byte budget (>= min_rows)."""
    limit = max(1, min(cap, _ROW_TILE_BYTES // max(row_bytes, 1), h))
    th = h
    for d in range(limit, 0, -1):
        if h % d == 0:
            th = d
            break
    if th < min_rows:
        th = h
    return th


# ---------------------------------------------------------------------------
# Pallas kernels
# ---------------------------------------------------------------------------

def _conv_kernel(x_ref, h_ref, w_ref, b_ref, o_ref, *, kh, kw, th, wo, act):
    """Stride-1 'valid' conv for one (batch, row-tile) program.

    Main rows come from x_ref, the KH-1 halo rows from the second stream h_ref.
    KH*KW shifted matmuls (bf16 operands, f32 accumulation) + fused bias/activation.
    """
    cin = x_ref.shape[-1]
    cout = w_ref.shape[-1]
    xm = x_ref[0]                                   # (TH, Wp, Cin)  bf16
    if kh > 1:
        xh = h_ref[0]                               # next row-tile (halo source)
        xv = jnp.concatenate([xm, xh[:kh - 1]], axis=0)   # (TH+KH-1, Wp, Cin)
    else:
        xv = xm
    acc = jnp.zeros((th * wo, cout), jnp.float32)
    for i in range(kh):
        for j in range(kw):
            patch = xv[i:i + th, j:j + wo, :].reshape(th * wo, cin)
            acc = acc + jnp.dot(patch, w_ref[i, j],
                                preferred_element_type=jnp.float32)
    y = acc + b_ref[...].astype(jnp.float32)        # (1, Cout) broadcast
    if act == 'swish':
        y = y * jax.nn.sigmoid(y)
    elif act == 'tanh':
        y = jnp.tanh(y)
    o_ref[0] = y.reshape(th, wo, cout).astype(o_ref.dtype)


def _bn_stats_kernel(x_ref, s1_ref, s2_ref):
    """Pass 1: per-channel sum / sum-of-squares, accumulated across the whole grid."""
    @pl.when((pl.program_id(0) == 0) & (pl.program_id(1) == 0))
    def _init():
        s1_ref[...] = jnp.zeros_like(s1_ref)
        s2_ref[...] = jnp.zeros_like(s2_ref)

    x = x_ref[0].astype(jnp.float32)                # (TH, W, C)
    s1_ref[...] += jnp.sum(jnp.sum(x, axis=0), axis=0, keepdims=True)
    s2_ref[...] += jnp.sum(jnp.sum(x * x, axis=0), axis=0, keepdims=True)


def _bn_apply_kernel(*refs, act, has_res):
    """Pass 2: y = x*scale + shift (+ Swish) (+ residual), tiled like the conv output."""
    if has_res:
        x_ref, a_ref, b_ref, r_ref, o_ref = refs
    else:
        x_ref, a_ref, b_ref, o_ref = refs
        r_ref = None
    x = x_ref[0].astype(jnp.float32)                # (TH, W, C)
    a = a_ref[...].astype(jnp.float32).reshape(1, 1, -1)
    b = b_ref[...].astype(jnp.float32).reshape(1, 1, -1)
    y = x * a + b
    if act == 'swish':
        y = y * jax.nn.sigmoid(y)
    if has_res:
        y = y + r_ref[0].astype(jnp.float32)
    o_ref[0] = y.astype(o_ref.dtype)


# ---------------------------------------------------------------------------
# Kernel wrappers
# ---------------------------------------------------------------------------

def conv2d(x, w, b, *, act='none'):
    """Row-tiled stride-1 'valid' conv on a pre-padded NHWC image.

    x: (N, Hp, Wp, Cin) already spatially padded.  w: (KH, KW, Cin, Cout) HWIO bf16.
    b: (1, Cout) f32.  Fused bias + optional Swish/Tanh epilogue.
    """
    x = x.astype(w.dtype)
    N, Hp, Wp, Cin = x.shape
    KH, KW, _, Cout = w.shape
    Ho, Wo = Hp - KH + 1, Wp - KW + 1

    TH = _pick_rows(Ho, Wp * Cin * x.dtype.itemsize, min_rows=max(1, KH - 1))
    assert TH >= KH - 1, "row tile too small for the conv halo"
    HT = Ho // TH
    # pad rows so the halo block (row-tile t+1) always exists
    pad_rows = (HT + 1) * TH - Hp
    if pad_rows > 0:
        x = jnp.pad(x, ((0, 0), (0, pad_rows), (0, 0), (0, 0)))

    kern = functools.partial(_conv_kernel, kh=KH, kw=KW, th=TH, wo=Wo, act=act)
    return pl.pallas_call(
        kern,
        out_shape=jax.ShapeDtypeStruct((N, Ho, Wo, Cout), DTYPE),
        grid=(N, HT),
        in_specs=[
            pl.BlockSpec((1, TH, Wp, Cin), lambda n, t: (n, t, 0, 0)),       # main rows
            pl.BlockSpec((1, TH, Wp, Cin), lambda n, t: (n, t + 1, 0, 0)),   # halo rows
            pl.BlockSpec((KH, KW, Cin, Cout), lambda n, t: (0, 0, 0, 0)),    # resident W
            pl.BlockSpec((1, Cout), lambda n, t: (0, 0)),                    # resident b
        ],
        out_specs=pl.BlockSpec((1, TH, Wo, Cout), lambda n, t: (n, t, 0, 0)),
        compiler_params=pltpu.CompilerParams(
            dimension_semantics=("parallel", "parallel"),
            vmem_limit_bytes=_VMEM_LIMIT),
    )(x, x, w, b)


def batchnorm(x, gamma, beta, *, act='none', residual=None, eps=1e-5):
    """Training-mode BatchNorm2d (exact batch stats over N,H,W) as a two-pass tiled
    kernel pair; scale/shift folding, Swish and the residual add fused into pass 2."""
    N, H, W, C = x.shape
    TH = _pick_rows(H, W * C * x.dtype.itemsize)
    HT = H // TH

    s1, s2 = pl.pallas_call(
        _bn_stats_kernel,
        out_shape=(jax.ShapeDtypeStruct((1, C), jnp.float32),
                   jax.ShapeDtypeStruct((1, C), jnp.float32)),
        grid=(N, HT),
        in_specs=[pl.BlockSpec((1, TH, W, C), lambda n, t: (n, t, 0, 0))],
        out_specs=(pl.BlockSpec((1, C), lambda n, t: (0, 0)),
                   pl.BlockSpec((1, C), lambda n, t: (0, 0))),
        compiler_params=pltpu.CompilerParams(
            dimension_semantics=("arbitrary", "arbitrary"),
            vmem_limit_bytes=_VMEM_LIMIT),
    )(x)

    cnt = float(N * H * W)
    mean = s1 / cnt
    var = jnp.maximum(s2 / cnt - mean * mean, 0.0)     # biased variance (PyTorch BN fwd)
    scale = gamma * jax.lax.rsqrt(var + eps)
    shift = beta - mean * scale

    has_res = residual is not None
    operands = [x, scale, shift] + ([residual.astype(DTYPE)] if has_res else [])
    in_specs = [pl.BlockSpec((1, TH, W, C), lambda n, t: (n, t, 0, 0)),
                pl.BlockSpec((1, C), lambda n, t: (0, 0)),
                pl.BlockSpec((1, C), lambda n, t: (0, 0))]
    if has_res:
        in_specs.append(pl.BlockSpec((1, TH, W, C), lambda n, t: (n, t, 0, 0)))

    return pl.pallas_call(
        functools.partial(_bn_apply_kernel, act=act, has_res=has_res),
        out_shape=jax.ShapeDtypeStruct((N, H, W, C), DTYPE),
        grid=(N, HT),
        in_specs=in_specs,
        out_specs=pl.BlockSpec((1, TH, W, C), lambda n, t: (n, t, 0, 0)),
        compiler_params=pltpu.CompilerParams(
            dimension_semantics=("parallel", "parallel"),
            vmem_limit_bytes=_VMEM_LIMIT),
    )(*operands)


# ---------------------------------------------------------------------------
# JAX glue: padding, phase decompositions, resampling
# ---------------------------------------------------------------------------

def reflect_pad(x, p):
    return jnp.pad(x, ((0, 0), (p, p), (p, p), (0, 0)), mode='reflect')


def zero_pad(x, p):
    return jnp.pad(x, ((0, 0), (p, p), (p, p), (0, 0)))


def conv2d_stride2(x, wph, b, *, act='none'):
    """3x3 / stride-2 / zero-pad-1 conv, phase-decomposed into a single stride-1 2x2
    conv over the 4 input parities (4x fewer FLOPs than conv+subsample, 4x larger K)."""
    N, H, W, C = x.shape
    ho = (H + 2 - 3) // 2 + 1
    wo = (W + 2 - 3) // 2 + 1
    xp = jnp.pad(x, ((0, 0), (1, 2), (1, 2), (0, 0)))   # conv zero-pad 1 (+1 parity guard)
    phases = [xp[:, a:a + 2 * (ho + 1):2, c:c + 2 * (wo + 1):2, :] for a, c in _PHASES]
    xph = jnp.concatenate(phases, axis=-1)              # (N, ho+1, wo+1, 4C)
    return conv2d(xph, wph, b, act=act)


def conv_transpose2d(x, wph, b):
    """ConvTranspose2d(k=3, s=2, p=1, output_padding=1), phase-decomposed: one stride-1
    2x2 conv producing the 4 output parities as channel groups + cheap depth-to-space."""
    N, H, W, C = x.shape
    cout = wph.shape[-1] // 4
    xp = jnp.pad(x, ((0, 0), (0, 1), (0, 1), (0, 0)))
    y = conv2d(xp, wph, b, act='none')                  # (N, H, W, 4*cout)
    y = y.reshape(N, H, W, 2, 2, cout)
    y = jnp.transpose(y, (0, 1, 3, 2, 4, 5)).reshape(N, 2 * H, 2 * W, cout)
    return y


def upsample2x_bilinear_align_corners(x):
    # TODO(synk): align_corners=True gives per-row fractional weights (src = i*(H-1)/(2H-1)),
    # not a fixed 4-phase stencil, so it is not folded into the following conv; kept in JAX.
    N, H, W, C = x.shape

    def coords(n_in, n_out):
        src = jnp.arange(n_out, dtype=jnp.float32) * (n_in - 1) / (n_out - 1)
        i0 = jnp.clip(jnp.floor(src).astype(jnp.int32), 0, n_in - 2)
        return i0, src - i0.astype(jnp.float32)

    i0, fh = coords(H, 2 * H)
    j0, fw = coords(W, 2 * W)
    xf = x.astype(jnp.float32)
    xh = xf[:, i0] * (1.0 - fh)[None, :, None, None] + xf[:, i0 + 1] * fh[None, :, None, None]
    y = xh[:, :, j0] * (1.0 - fw)[None, None, :, None] + xh[:, :, j0 + 1] * fw[None, None, :, None]
    return y.astype(DTYPE)


# ---------------------------------------------------------------------------
# Deterministic parameter initialization (synthetic weights)
# ---------------------------------------------------------------------------

def _spectral_sigma(mat, iters=25):
    u = jnp.ones((mat.shape[0],), jnp.float32) / np.sqrt(mat.shape[0])
    v = mat.T @ u
    for _ in range(iters):
        v = mat.T @ u
        v = v / (jnp.linalg.norm(v) + 1e-12)
        u = mat @ v
        u = u / (jnp.linalg.norm(u) + 1e-12)
    return jnp.dot(u, mat @ v)


def _init_conv_raw(key, cin, cout, k, spectral=True):
    kw_, kb_ = jax.random.split(key)
    w = jax.random.normal(kw_, (cout, cin, k, k), jnp.float32) / np.sqrt(cin * k * k)
    b = 0.01 * jax.random.normal(kb_, (cout,), jnp.float32)
    if spectral:
        # spectral norm folded into the weight at init (converged power iteration)
        w = w / _spectral_sigma(w.reshape(cout, -1))
    return jnp.transpose(w, (2, 3, 1, 0)), b            # OIHW -> HWIO


def init_conv(key, cin, cout, k, spectral=True):
    w, b = _init_conv_raw(key, cin, cout, k, spectral)
    return {'w': w.astype(DTYPE), 'b': b.reshape(1, cout)}


def init_conv_s2(key, cin, cout, spectral=True):
    """3x3 stride-2 conv stored directly as its (2, 2, 4*Cin, Cout) phase-folded weight."""
    w, b = _init_conv_raw(key, cin, cout, 3, spectral)  # (3,3,cin,cout)
    wph = jnp.zeros((2, 2, 4 * cin, cout), jnp.float32)
    for p, (a, c) in enumerate(_PHASES):
        for di in range(2):
            for dj in range(2):
                ih, iw = a + 2 * di, c + 2 * dj
                if ih < 3 and iw < 3:
                    wph = wph.at[di, dj, p * cin:(p + 1) * cin, :].set(w[ih, iw])
    return {'w': wph.astype(DTYPE), 'b': b.reshape(1, cout)}


def init_convT(key, cin, cout, k=3):
    """ConvTranspose2d(k=3,s=2,p=1,op=1) stored as its (2, 2, Cin, 4*Cout) phase weight."""
    kw_, kb_ = jax.random.split(key)
    w = jax.random.normal(kw_, (cin, cout, k, k), jnp.float32) / np.sqrt(cin * k * k)
    b = 0.01 * jax.random.normal(kb_, (cout,), jnp.float32)
    w = w / _spectral_sigma(w.reshape(cin, -1))         # SN flattens dim 0 (= Cin)
    # out[2m+a, 2n+c] = sum_{di,dj} x0pad[m+di, n+dj] . w[:, :, kh, kw]  per the taps below
    taps = {(0, 0): {(0, 0): (1, 1)},
            (0, 1): {(0, 0): (1, 2), (0, 1): (1, 0)},
            (1, 0): {(0, 0): (2, 1), (1, 0): (0, 1)},
            (1, 1): {(0, 0): (2, 2), (0, 1): (2, 0), (1, 0): (0, 2), (1, 1): (0, 0)}}
    wph = jnp.zeros((2, 2, cin, 4 * cout), jnp.float32)
    for p, ac in enumerate(_PHASES):
        for (di, dj), (ih, iw) in taps[ac].items():
            wph = wph.at[di, dj, :, p * cout:(p + 1) * cout].set(w[:, :, ih, iw])
    bph = jnp.tile(b.reshape(1, cout), (1, 4))
    return {'w': wph.astype(DTYPE), 'b': bph}


def init_bn(key, c):
    k1, k2 = jax.random.split(key)
    return {'g': 1.0 + 0.1 * jax.random.normal(k1, (1, c), jnp.float32),
            'be': 0.1 * jax.random.normal(k2, (1, c), jnp.float32)}


def init_resblock(key, dim):
    k1, k2, k3 = jax.random.split(key, 3)
    return {'c1': init_conv(k1, dim, dim, 3),
            'c2': init_conv(k2, dim, dim, 3),
            'bn': init_bn(k3, dim)}


def init_local_enhancer(key, input_nc, output_nc, ngf=32, n_downsample_global=3,
                        n_blocks_global=9, n_local_enhancers=1, n_blocks_local=3):
    assert n_local_enhancers == 1
    keys = iter(jax.random.split(key, 256))
    nk = lambda: next(keys)

    # GlobalGenerator (last 3 layers dropped by LocalEnhancer)
    ngf_g = ngf * 2 ** n_local_enhancers
    gp = {'c7': init_conv(nk(), input_nc, ngf_g, 7), 'bn7': init_bn(nk(), ngf_g),
          'down': [], 'res': [], 'up': []}
    for i in range(n_downsample_global):
        mult = 2 ** i
        gp['down'].append({'conv': init_conv_s2(nk(), ngf_g * mult, ngf_g * mult * 2),
                           'bn': init_bn(nk(), ngf_g * mult * 2)})
    mult = 2 ** n_downsample_global
    gp['res'] = [init_resblock(nk(), ngf_g * mult) for _ in range(n_blocks_global)]
    for i in range(n_downsample_global):
        mult = 2 ** (n_downsample_global - i)
        gp['up'].append(init_conv(nk(), ngf_g * mult, ngf_g * mult // 2, 3))

    # Local enhancer branch (n = 1)
    ngf_l = ngf * 2 ** (n_local_enhancers - 1)
    lp = {'c7': init_conv(nk(), input_nc, ngf_l, 7), 'bn7': init_bn(nk(), ngf_l),
          'c3': init_conv_s2(nk(), ngf_l, ngf_l * 2), 'bn3': init_bn(nk(), ngf_l * 2),
          'res': [init_resblock(nk(), ngf_l * 2) for _ in range(n_blocks_local)],
          'ct': init_convT(nk(), ngf_l * 2, ngf_l), 'bnct': init_bn(nk(), ngf_l),
          'final': init_conv(nk(), ngf, output_nc, 7)}

    dwn = init_conv_s2(nk(), input_nc, output_nc, spectral=False)   # self.downsample (no SN)
    return {'global': gp, 'local': lp, 'downsample': dwn}


# ---------------------------------------------------------------------------
# Forward pass
# ---------------------------------------------------------------------------

def resnet_block_forward(x, p):
    h = conv2d(reflect_pad(x, 1), p['c1']['w'], p['c1']['b'], act='swish')
    h = conv2d(reflect_pad(h, 1), p['c2']['w'], p['c2']['b'], act='none')
    # BN (batch stats) with the residual add fused into the apply pass
    return batchnorm(h, p['bn']['g'], p['bn']['be'], act='none', residual=x)


def global_forward(x, gp):
    h = conv2d(reflect_pad(x, 3), gp['c7']['w'], gp['c7']['b'])
    h = batchnorm(h, gp['bn7']['g'], gp['bn7']['be'], act='swish')
    for d in gp['down']:
        h = conv2d_stride2(h, d['conv']['w'], d['conv']['b'])
        h = batchnorm(h, d['bn']['g'], d['bn']['be'], act='swish')
    for rb in gp['res']:
        h = resnet_block_forward(h, rb)
    for u in gp['up']:
        h = upsample2x_bilinear_align_corners(h)
        h = conv2d(zero_pad(h, 1), u['w'], u['b'], act='swish')
    return h


def local_enhancer_forward(x_nchw, params):
    x = jnp.transpose(x_nchw, (0, 2, 3, 1)).astype(DTYPE)          # NCHW -> NHWC
    # input_downsampled[1] = self.downsample(input)
    xd = conv2d_stride2(x, params['downsample']['w'], params['downsample']['b'])
    out_prev = global_forward(xd, params['global'])

    lp = params['local']
    h = conv2d(reflect_pad(x, 3), lp['c7']['w'], lp['c7']['b'])
    h = batchnorm(h, lp['bn7']['g'], lp['bn7']['be'], act='swish')
    h = conv2d_stride2(h, lp['c3']['w'], lp['c3']['b'])
    # swish(BN(.)) + output_prev, with the add fused into the BN apply pass
    h = batchnorm(h, lp['bn3']['g'], lp['bn3']['be'], act='swish', residual=out_prev)
    for rb in lp['res']:
        h = resnet_block_forward(h, rb)
    h = conv_transpose2d(h, lp['ct']['w'], lp['ct']['b'])
    h = batchnorm(h, lp['bnct']['g'], lp['bnct']['be'], act='swish')
    h = conv2d(reflect_pad(h, 3), lp['final']['w'], lp['final']['b'], act='tanh')
    return jnp.transpose(h, (0, 3, 1, 2)).astype(jnp.float32)      # NHWC -> NCHW


# ---------------------------------------------------------------------------

if __name__ == "__main__":
    key = jax.random.PRNGKey(0)
    pkey, xkey = jax.random.split(key)

    # small but structurally faithful config: input_nc == output_nc (required by the
    # module's own forward), ngf reduced to keep channel counts small
    input_nc = output_nc = 4
    params = init_local_enhancer(pkey, input_nc, output_nc, ngf=4,
                                 n_downsample_global=3, n_blocks_global=9,
                                 n_local_enhancers=1, n_blocks_local=3)

    x = jax.random.normal(xkey, (2, input_nc, 32, 32), jnp.float32)   # NCHW like PyTorch
    y = local_enhancer_forward(x, params)
    y = jax.block_until_ready(y)

    assert y.shape == (2, output_nc, 32, 32), y.shape
    assert bool(jnp.all(jnp.isfinite(y)))
    assert bool(jnp.all(jnp.abs(y) <= 1.0 + 1e-6))   # final Tanh
    print("KERNEL_OK")
</pallas_src>

<mosaic_0001>
module attributes {stable_mosaic.version = 11 : i64} {
  func.func @_conv_kernel(%arg0: i32, %arg1: i32, %arg2: memref<1x16x17x16xbf16, #tpu.memory_space<vmem>>, %arg3: memref<1x16x17x16xbf16, #tpu.memory_space<vmem>>, %arg4: memref<2x2x16x4xbf16, #tpu.memory_space<vmem>>, %arg5: memref<1x4xf32, #tpu.memory_space<vmem>>, %arg6: memref<1x16x16x4xbf16, #tpu.memory_space<vmem>>) attributes {dimension_semantics = [#tpu.dimension_semantics<parallel>, #tpu.dimension_semantics<parallel>], iteration_bounds = array<i64: 2, 1>, scalar_prefetch = 0 : i64, scratch_operands = 0 : i64, tpu.core_type = #tpu.core_type<tc>, window_params = [{transform_indices = @transform_0, window_bounds = array<i64: 1, 16, 17, 16>}, {transform_indices = @transform_1, window_bounds = array<i64: 1, 16, 17, 16>}, {pipeline_mode = #tpu.pipeline_mode<synchronous>, transform_indices = @transform_2, window_bounds = array<i64: 2, 2, 16, 4>}, {pipeline_mode = #tpu.pipeline_mode<synchronous>, transform_indices = @transform_3, window_bounds = array<i64: 1, 4>}, {transform_indices = @transform_4, window_bounds = array<i64: 1, 16, 16, 4>}]} {
    %c0 = arith.constant 0 : index
    %c0_0 = arith.constant 0 : index
    %c0_1 = arith.constant 0 : index
    %c0_2 = arith.constant 0 : index
    %0 = vector.load %arg2[%c0, %c0_0, %c0_1, %c0_2] : memref<1x16x17x16xbf16, #tpu.memory_space<vmem>>, vector<1x16x17x16xbf16>
    %1 = vector.shape_cast %0 : vector<1x16x17x16xbf16> to vector<16x17x16xbf16>
    %c0_3 = arith.constant 0 : index
    %c0_4 = arith.constant 0 : index
    %c0_5 = arith.constant 0 : index
    %c0_6 = arith.constant 0 : index
    %2 = vector.load %arg3[%c0_3, %c0_4, %c0_5, %c0_6] : memref<1x16x17x16xbf16, #tpu.memory_space<vmem>>, vector<1x16x17x16xbf16>
    %3 = vector.shape_cast %2 : vector<1x16x17x16xbf16> to vector<16x17x16xbf16>
    %4 = vector.extract_strided_slice %3 {offsets = [0, 0, 0], sizes = [1, 17, 16], strides = [1, 1, 1]} : vector<16x17x16xbf16> to vector<1x17x16xbf16>
    %5 = tpu.concatenate %1, %4 in 0 : vector<16x17x16xbf16>, vector<1x17x16xbf16> -> vector<17x17x16xbf16>
    %cst = arith.constant 0.000000e+00 : f32
    %6 = vector.broadcast %cst : f32 to vector<256x4xf32>
    %7 = vector.extract_strided_slice %5 {offsets = [0, 0, 0], sizes = [16, 16, 16], strides = [1, 1, 1]} : vector<17x17x16xbf16> to vector<16x16x16xbf16>
    %8 = vector.shape_cast %7 : vector<16x16x16xbf16> to vector<256x16xbf16>
    %c0_7 = arith.constant 0 : index
    %c0_8 = arith.constant 0 : index
    %c0_9 = arith.constant 0 : index
    %c0_10 = arith.constant 0 : index
    %9 = vector.load %arg4[%c0_7, %c0_8, %c0_9, %c0_10] : memref<2x2x16x4xbf16, #tpu.memory_space<vmem>>, vector<1x1x16x4xbf16>
    %10 = vector.shape_cast %9 : vector<1x1x16x4xbf16> to vector<16x4xbf16>
    %cst_11 = arith.constant dense<0.000000e+00> : vector<256x4xf32>
    %11 = tpu.matmul %8, %10, %cst_11 {dimension_numbers = #tpu.dot_dimension_numbers<[1], [0], [0], [1], [0, 0, 1, 1], [], []>} : vector<256x16xbf16>, vector<16x4xbf16>, vector<256x4xf32> -> vector<256x4xf32>
    %12 = arith.addf %6, %11 : vector<256x4xf32>
    %13 = vector.extract_strided_slice %5 {offsets = [0, 1, 0], sizes = [16, 16, 16], strides = [1, 1, 1]} : vector<17x17x16xbf16> to vector<16x16x16xbf16>
    %14 = vector.shape_cast %13 : vector<16x16x16xbf16> to vector<256x16xbf16>
    %c0_12 = arith.constant 0 : index
    %c1 = arith.constant 1 : index
    %c0_13 = arith.constant 0 : index
    %c0_14 = arith.constant 0 : index
    %15 = vector.load %arg4[%c0_12, %c1, %c0_13, %c0_14] : memref<2x2x16x4xbf16, #tpu.memory_space<vmem>>, vector<1x1x16x4xbf16>
    %16 = vector.shape_cast %15 : vector<1x1x16x4xbf16> to vector<16x4xbf16>
    %cst_15 = arith.constant dense<0.000000e+00> : vector<256x4xf32>
    %17 = tpu.matmul %14, %16, %cst_15 {dimension_numbers = #tpu.dot_dimension_numbers<[1], [0], [0], [1], [0, 0, 1, 1], [], []>} : vector<256x16xbf16>, vector<16x4xbf16>, vector<256x4xf32> -> vector<256x4xf32>
    %18 = arith.addf %12, %17 : vector<256x4xf32>
    %19 = vector.extract_strided_slice %5 {offsets = [1, 0, 0], sizes = [16, 16, 16], strides = [1, 1, 1]} : vector<17x17x16xbf16> to vector<16x16x16xbf16>
    %20 = vector.shape_cast %19 : vector<16x16x16xbf16> to vector<256x16xbf16>
    %c1_16 = arith.constant 1 : index
    %c0_17 = arith.constant 0 : index
    %c0_18 = arith.constant 0 : index
    %c0_19 = arith.constant 0 : index
    %21 = vector.load %arg4[%c1_16, %c0_17, %c0_18, %c0_19] : memref<2x2x16x4xbf16, #tpu.memory_space<vmem>>, vector<1x1x16x4xbf16>
    %22 = vector.shape_cast %21 : vector<1x1x16x4xbf16> to vector<16x4xbf16>
    %cst_20 = arith.constant dense<0.000000e+00> : vector<256x4xf32>
    %23 = tpu.matmul %20, %22, %cst_20 {dimension_numbers = #tpu.dot_dimension_numbers<[1], [0], [0], [1], [0, 0, 1, 1], [], []>} : vector<256x16xbf16>, vector<16x4xbf16>, vector<256x4xf32> -> vector<256x4xf32>
    %24 = arith.addf %18, %23 : vector<256x4xf32>
    %25 = vector.extract_strided_slice %5 {offsets = [1, 1, 0], sizes = [16, 16, 16], strides = [1, 1, 1]} : vector<17x17x16xbf16> to vector<16x16x16xbf16>
    %26 = vector.shape_cast %25 : vector<16x16x16xbf16> to vector<256x16xbf16>
    %c1_21 = arith.constant 1 : index
    %c1_22 = arith.constant 1 : index
    %c0_23 = arith.constant 0 : index
    %c0_24 = arith.constant 0 : index
    %27 = vector.load %arg4[%c1_21, %c1_22, %c0_23, %c0_24] : memref<2x2x16x4xbf16, #tpu.memory_space<vmem>>, vector<1x1x16x4xbf16>
    %28 = vector.shape_cast %27 : vector<1x1x16x4xbf16> to vector<16x4xbf16>
    %cst_25 = arith.constant dense<0.000000e+00> : vector<256x4xf32>
    %29 = tpu.matmul %26, %28, %cst_25 {dimension_numbers = #tpu.dot_dimension_numbers<[1], [0], [0], [1], [0, 0, 1, 1], [], []>} : vector<256x16xbf16>, vector<16x4xbf16>, vector<256x4xf32> -> vector<256x4xf32>
    %30 = arith.addf %24, %29 : vector<256x4xf32>
    %c0_26 = arith.constant 0 : index
    %c0_27 = arith.constant 0 : index
    %31 = vector.load %arg5[%c0_26, %c0_27] : memref<1x4xf32, #tpu.memory_space<vmem>>, vector<1x4xf32>
    %32 = vector.broadcast %31 : vector<1x4xf32> to vector<256x4xf32>
    %33 = arith.addf %30, %32 : vector<256x4xf32>
    %34 = vector.shape_cast %33 : vector<256x4xf32> to vector<16x16x4xf32>
    %35 = arith.truncf %34 : vector<16x16x4xf32> to vector<16x16x4xbf16>
    %c0_28 = arith.constant 0 : index
    %c0_29 = arith.constant 0 : index
    %c0_30 = arith.constant 0 : index
    %c0_31 = arith.constant 0 : index
    %36 = vector.load %arg6[%c0_28, %c0_29, %c0_30, %c0_31] : memref<1x16x16x4xbf16, #tpu.memory_space<vmem>>, vector<1x16x16x4xbf16>
    %37 = vector.shape_cast %36 : vector<1x16x16x4xbf16> to vector<16x16x4xbf16>
    %38 = vector.shape_cast %35 : vector<16x16x4xbf16> to vector<1x16x16x4xbf16>
    tpu.vector_store %arg6[%c0_28, %c0_29, %c0_30, %c0_31], %38 {strides = array<i32>} : memref<1x16x16x4xbf16, #tpu.memory_space<vmem>>, vector<1x16x16x4xbf16>,
    return
  }
  func.func @transform_0(%arg0: i32, %arg1: i32) -> (i32, i32, i32, i32) {
    %c0_i32 = arith.constant 0 : i32
    %c0_i32_0 = arith.constant 0 : i32
    %c0_i32_1 = arith.constant 0 : i32
    return %arg0, %arg1, %c0_i32, %c0_i32_0 : i32, i32, i32, i32
  }
  func.func @transform_1(%arg0: i32, %arg1: i32) -> (i32, i32, i32, i32) {
    %c1_i32 = arith.constant 1 : i32
    %0 = arith.addi %arg1, %c1_i32 : i32
    %c0_i32 = arith.constant 0 : i32
    %c0_i32_0 = arith.constant 0 : i32
    %c0_i32_1 = arith.constant 0 : i32
    return %arg0, %0, %c0_i32, %c0_i32_0 : i32, i32, i32, i32
  }
  func.func @transform_2(%arg0: i32, %arg1: i32) -> (i32, i32, i32, i32) {
    %c0_i32 = arith.constant 0 : i32
    %c0_i32_0 = arith.constant 0 : i32
    %c0_i32_1 = arith.constant 0 : i32
    %c0_i32_2 = arith.constant 0 : i32
    %c0_i32_3 = arith.constant 0 : i32
    return %c0_i32, %c0_i32_0, %c0_i32_1, %c0_i32_2 : i32, i32, i32, i32
  }
  func.func @transform_3(%arg0: i32, %arg1: i32) -> (i32, i32) {
    %c0_i32 = arith.constant 0 : i32
    %c0_i32_0 = arith.constant 0 : i32
    %c0_i32_1 = arith.constant 0 : i32
    return %c0_i32, %c0_i32_0 : i32, i32
  }
  func.func @transform_4(%arg0: i32, %arg1: i32) -> (i32, i32, i32, i32) {
    %c0_i32 = arith.constant 0 : i32
    %c0_i32_0 = arith.constant 0 : i32
    %c0_i32_1 = arith.constant 0 : i32
    return %arg0, %arg1, %c0_i32, %c0_i32_0 : i32, i32, i32, i32
  }
}

</mosaic_0001>

<bundles_post_ra>
// kernel: tpu_custom_call.1
= control target key start
LH: loop header
LB: loop body
LE: loop exit
PB: predicated region body
PF: predicated region fallthrough
CT: control target
= control target key end

     0   :  { %s2634_s15 = smov 0   ;;  %s2636_s16 = smov 0   ;;  %s3226_s0 = inlined_call_operand.vmem [shape: bf16[2,32,17,16], index: 0, kind: input, shape index: {}]   ;;  %s3227_s1 = inlined_call_operand.vmem [shape: bf16[2,32,17,16], index: 1, kind: input, shape index: {}]   ;;  %s3228_s2 = inlined_call_operand.vmem [shape: bf16[2,2,16,4], index: 2, kind: input, shape index: {}]   ;;  %s3229_s3 = inlined_call_operand.vmem [shape: f32[1,4], index: 3, kind: input, shape index: {}]   ;;  %s3230_s4 = inlined_call_operand.vmem [shape: bf16[2,16,16,4], index: 4, kind: output, shape index: {}]  }
   0x1   :  { %s2638_s17 = smov 0  }
   0x2 LB: > { %s26_s18 = sadd.s32 1, %s2603_s16  ;;  %p2054_p0 = scmp.ge.s32.totalorder %s2607_s17, 1  ;;  %s2607_s17 = sphi %s2638_s17, %s14_s17   ;;  %s2603_s16 = sphi %s2636_s16, %s3234_s16   ;;  %s2599_s15 = sphi %s2634_s15, %s3233_s15  }
   0x3   : > { %p28_p1 = scmp.ge.s32.totalorder %s26_s18, 2  ;;  %p206_p2 = scmp.lt.s32.totalorder %s2607_s17, 3 }
   0x5   : > { %s3236_s18 = smov (%p28_p1, %s26_s18), 0  ;;  %p207_p3 = pnand %p2054_p0, %p206_p2 }
   0x6   : > { %v2564_v0 = vld [vmem:[%s3228_s2 + $0x10] sm:$0xff] (!%p207_p3)   ;;  %p254_p4 = scmp.lt.s32.totalorder (!%p207_p3), %s2599_s15, 1  ;;  %v2567_v1 = vld [vmem:[%s3228_s2 + $0x8] sm:$0xff] (!%p207_p3)   ;;  %v2663_v2 = vld [vmem:[%s3228_s2] sm:$0xff] (!%p207_p3)   ;;  %vm786_vm0 = vcmask (!%p207_p3), 130048   ;;  %vm1900_vm4 = vcmask (!%p207_p3), 27648  }
   0x7   : > { %210 = sbr.rel (%p207_p3) target bundleno = 385 (0x181), region = 36  ;;  %2373 = vmatprep.subr.bf16.mxu0 (!%p207_p3), %v2564_v0  ;;  %2305 = vmatprep.subr.bf16.mxu1 (!%p207_p3), %v2567_v1  ;;  %v2571_v3 = vld [vmem:[%s3228_s2 + $0x18] sm:$0xff] (!%p207_p3)   ;;  %vm342_vm1 = vsmask.f32 (!%p207_p3), 3328  ;;  %vm343_vm2 = vsmask.f32 (!%p207_p3), 7440 }
   0x8   : > { %2374 = vmatpush3.bf16.msra.mxu0 (!%p207_p3), %v2564_v0  ;;  %2306 = vmatpush3.bf16.msra.mxu1 (!%p207_p3), %v2567_v1  ;;  %vm2728_vm3 = vmor (!%p207_p3), %vm342_vm1, %vm343_vm2 }
   0x9   : > { %2339 = vmatprep.subr.bf16.mxu1 (!%p207_p3), %v2663_v2  ;;  %2407 = vmatprep.subr.bf16.mxu0 (!%p207_p3), %v2571_v3 }
   0xe   : > { %s3238_s15 = smov (!%p254_p4, %s2599_s15), 1 }
   0xf   : > { %s2537_s25 = smul.u32 384, %s3238_s15  ;;  %s2204_s11 = sshll.u32 %s3238_s15, 7 }
  0x10   : > { %s3120_s14 = scalar_lea.vmem %s3230_s4, %s2204_s11 }
  0x11   : > { %s2675_s30 = scalar_lea.vmem %s3226_s0, %s2537_s25  ;;  %s2203_s5 = sadd.s32 192, %s2537_s25 }
  0x12   : > { %v292_v4 = vld [vmem:[%s2675_s30 + $0xc] sm:$0xf]  ;;  %v293_v5 = vld [vmem:[%s2675_s30 + $0x10] sm:$0xf]  ;;  %v295_v6 = vld [vmem:[%s2675_s30 + $0x18] sm:$0xf]  ;;  %s2968_s8 = scalar_lea.vmem %s3227_s1, %s2203_s5 }
  0x13   : > { %v370_v7 = vshrl.u32 %v292_v4, 16  ;;  %v373_v8 = vshll.u32 %v292_v4, 16  ;;  %v379_v9 = vshll.u32 %v293_v5, 16  ;;  %v383_v10 = vshrl.u32 %v293_v5, 16  ;;  %v296_v11 = vld [vmem:[%s2675_s30 + $0x1c] sm:$0xf] }
  0x14   : > { %v2681_v12 = vcombine.low %v292_v4, %v293_v5  ;;  %v394_v13 = vshrl.u32 %v295_v6, 16  ;;  %v397_v14 = vshll.u32 %v295_v6, 16  ;;  %v403_v15 = vshll.u32 %v296_v11, 16  ;;  %v298_v20 = vld [vmem:[%s2675_s30 + $0x24] sm:$0xf] }
  0x15   : > { %v372_v16 = vrot.slane %v370_v7, 4  ;;  %v375_v17 = vrot.slane %v373_v8, 5  ;;  %v2683_v18 = vrot.slane %v379_v9, 5  ;;  %v385_v19 = vrot.slane %v383_v10, 4  ;;  %v299_v21 = vld [vmem:[%s2675_s30 + $0x28] sm:$0xf] }
  0x16   : > { %2375 = vmatprep.mubr.msk.bf16.mxu0 %vm786_vm0, %v2681_v12  ;;  %v2689_v22 = vrot.slane %v394_v13, 4  ;;  %v2691_v23 = vcombine.low %v295_v6, %v296_v11  ;;  %v2694_v24 = vld [vmem:[%s2675_s30] sm:$0xf]  ;;  %v2696_v26 = vrot.slane %v397_v14, 5  ;;  %v407_v27 = vshrl.u32 %v296_v11, 16 }
  0x17   : > { %v376_v25 = vor.u32 %v375_v17, %v372_v16  ;;  %v2699_v28 = vld [vmem:[%s2675_s30 + $0x4] sm:$0xf]  ;;  %v291_v29 = vld [vmem:[%s2675_s30 + $0x8] sm:$0x1]  ;;  %v386_v30 = vor.u32 %v385_v19, %v2683_v18  ;;  %v2703_v31 = vrot.slane %v403_v15, 5  ;;  %v418_v32 = vshrl.u32 %v298_v20, 16 }
  0x18   : > { %2376 = vmatmul.mubr.msk.bf16.vlgmr.msra.gmra.mrb[0].mxu0 %vm786_vm0, %v2691_v23  ;;  %v2707_v33 = vcombine.low %v298_v20, %v299_v21  ;;  %v421_v34 = vshll.u32 %v298_v20, 16  ;;  %v427_v35 = vshll.u32 %v299_v21, 16  ;;  %v431_v36 = vshrl.u32 %v299_v21, 16  ;;  %v301_v42 = vld [vmem:[%s2675_s30 + $0x30] sm:$0xf] }
  0x19   : > { %v346_v37 = vshrl.u32 %v2694_v24, 16  ;;  %2408 = vmatpush3.bf16.msra.mxu0 %v2571_v3  ;;  %v349_v38 = vshll.u32 %v2694_v24, 16  ;;  %v355_v39 = vshll.u32 %v2699_v28, 16  ;;  %v359_v40 = vshrl.u32 %v2699_v28, 16  ;;  %v302_v46 = vld [vmem:[%s2675_s30 + $0x34] sm:$0xf] }
  0x1a   : > { %2379 = vmatprep.mubr.msk.bf16.mxu0 %vm786_vm0, %v2707_v33  ;;  %v365_v41 = vshll.u32 %v291_v29, 16  ;;  %v377_v43 = vrot.slane %v376_v25, 4  ;;  %v409_v44 = vrot.slane %v407_v27, 4  ;;  %v442_v47 = vshrl.u32 %v301_v42, 16  ;;  %v294_v52 = vld [vmem:[%s2675_s30 + $0x14] sm:$0x1] }
  0x1b   : > { %v348_v45 = vrot.slane %v346_v37, 4  ;;  %v387_v48 = vrot.slane %v386_v30, 4  ;;  %v351_v49 = vrot.slane %v349_v38, 5  ;;  %v357_v50 = vrot.slane %v355_v39, 5  ;;  %v304_v62 = vld [vmem:[%s2675_s30 + $0x3c] sm:$0xf] }
  0x1c   : > { %v361_v51 = vrot.slane %v359_v40, 4  ;;  %v2718_v53 = vrot.slane %v418_v32, 4  ;;  %v2720_v54 = vrot.slane %v421_v34, 5  ;;  %v2722_v55 = vrot.slane %v427_v35, 5  ;;  %v305_v63 = vld [vmem:[%s2675_s30 + $0x40] sm:$0xf] }
  0x1d   : > { %v2724_v56 = vrot.slane %v431_v36, 4  ;;  %v352_v58 = vor.u32 %v351_v49, %v348_v45  ;;  %v367_v60 = vrot.slane %v365_v41, 5  ;;  %v2732_v61 = vcombine.low %v301_v42, %v302_v46  ;;  %v297_v14 = vld [vmem:[%s2675_s30 + $0x20] sm:$0x1]  ;;  %v307_v27 = vld [vmem:[%s2675_s30 + $0x48] sm:$0xf] }
  0x1e   : > { %v362_v59 = vor.u32 %v361_v51, %v357_v50  ;;  %v2736_v0 = vrot.slane %v442_v47, 4  ;;  %v445_v1 = vshll.u32 %v301_v42, 16  ;;  %v451_v3 = vshll.u32 %v302_v46, 16  ;;  %v308_v29 = vld [vmem:[%s2675_s30 + $0x4c] sm:$0xf] }
  0x1f   : > { %v389_v4 = vshll.u32 %v294_v52, 16  ;;  %v353_v5 = vrot.slane %v352_v58, 4  ;;  %v455_v7 = vshrl.u32 %v302_v46, 16  ;;  %v382_v8 = vsel %vm2728_vm3, %v377_v43, %v2683_v18  ;;  %v300_v40 = vld [vmem:[%s2675_s30 + $0x2c] sm:$0x1] }
  0x20   : > { %v363_v6 = vrot.slane %v362_v59, 4  ;;  %2380 = vmatmul.mubr.msk.bf16.gmra.mrb[4].mxu0 %vm786_vm0, %v2732_v61  ;;  %v466_v10 = vshrl.u32 %v304_v62, 16  ;;  %v469_v11 = vshll.u32 %v304_v62, 16  ;;  %v2743_v13 = vcombine.low %v304_v62, %v305_v63  ;;  %v310_v47 = vld [vmem:[%s2675_s30 + $0x54] sm:$0xf] }
  0x21   : > { %v391_v9 = vrot.slane %v389_v4, 5  ;;  %v358_v15 = vsel %vm2728_vm3, %v353_v5, %v357_v50  ;;  %v475_v17 = vshll.u32 %v305_v63, 16  ;;  %v479_v19 = vshrl.u32 %v305_v63, 16  ;;  %v311_v51 = vld [vmem:[%s2675_s30 + $0x58] sm:$0xf] }
  0x22   : > { %v368_v16 = vsel %vm2728_vm3, %v363_v6, %v367_v60  ;;  %2383 = vmatprep.mubr.msk.bf16.mxu0 %vm786_vm0, %v2743_v13  ;;  %v400_v21 = vor.u32 %v2696_v26, %v2689_v22  ;;  %v410_v25 = vor.u32 %v409_v44, %v2703_v31  ;;  %v447_v30 = vrot.slane %v445_v1, 5  ;;  %v303_v63 = vld [vmem:[%s2675_s30 + $0x38] sm:$0x1] }
  0x23   : > { %v2061_v20 = vcombine.low %v358_v15, %v368_v16  ;;  %v392_v18 = vsel %vm2728_vm3, %v387_v48, %v391_v9  ;;  %v2759_v32 = vrot.slane %v451_v3, 5  ;;  %v413_v35 = vshll.u32 %v297_v14, 16  ;;  %v313_v9 = vld [vmem:[%s2675_s30 + $0x60] sm:$0xf] }
  0x24   : > { %v2761_v34 = vcombine.low %v382_v8, %v392_v18  ;;  %v457_v36 = vrot.slane %v455_v7, 4  ;;  %v2764_v37 = vrot.slane %v466_v10, 4  ;;  %v401_v38 = vrot.slane %v400_v21, 4  ;;  %v314_v10 = vld [vmem:[%s2675_s30 + $0x64] sm:$0xf] }
  0x25   : > { %2307 = vmatprep.mubr.msk.bf16.mxu1 %vm786_vm0, %v2061_v20  ;;  %v411_v39 = vrot.slane %v410_v25, 4  ;;  %v2769_v22 = vrot.slane %v469_v11, 5  ;;  %v415_v26 = vrot.slane %v413_v35, 5  ;;  %v490_v41 = vshrl.u32 %v307_v27, 16 }
  0x26   : > { %2308 = vmatmul.mubr.msk.bf16.vlgmr.msra.gmra.mrb[0].mxu1 %vm786_vm0, %v2761_v34  ;;  %v2771_v42 = vcombine.low %v307_v27, %v308_v29  ;;  %v2774_v43 = vrot.slane %v475_v17, 5  ;;  %v481_v44 = vrot.slane %v479_v19, 4  ;;  %v406_v45 = vsel %vm2728_vm3, %v401_v38, %v2703_v31  ;;  %v316_v38 = vld [vmem:[%s2675_s30 + $0x6c] sm:$0xf] }
  0x27   : > { %2340 = vmatpush3.bf16.msra.mxu1 %v2663_v2  ;;  %v424_v46 = vor.u32 %v2720_v54, %v2718_v53  ;;  %v416_v48 = vsel %vm2728_vm3, %v411_v39, %v415_v26  ;;  %v493_v49 = vshll.u32 %v307_v27, 16  ;;  %v434_v2 = vor.u32 %v2724_v56, %v2722_v55 }
  0x28   : > { %2384 = vmatmul.mubr.msk.bf16.gmra.mrb[8].mxu0 %vm786_vm0, %v2771_v42  ;;  %v437_v50 = vshll.u32 %v300_v40, 16  ;;  %v2789_v52 = vcombine.low %v406_v45, %v416_v48  ;;  %v499_v31 = vshll.u32 %v308_v29, 16  ;;  %v503_v58 = vshrl.u32 %v308_v29, 16  ;;  %v317_v45 = vld [vmem:[%s2675_s30 + $0x70] sm:$0xf] }
  0x29   : > { %v425_v53 = vrot.slane %v424_v46, 4  ;;  %v2791_v54 = vrot.slane %v490_v41, 4  ;;  %v435_v59 = vrot.slane %v434_v2, 4  ;;  %v514_v62 = vshrl.u32 %v310_v47, 16 }
  0x2a   : > { %v439_v60 = vrot.slane %v437_v50, 5  ;;  %2311 = vmatprep.mubr.msk.bf16.mxu1 %vm786_vm0, %v2789_v52  ;;  %v517_v1 = vshll.u32 %v310_v47, 16  ;;  %v523_v3 = vshll.u32 %v311_v51, 16  ;;  %v2799_v4 = vcombine.low %v310_v47, %v311_v51  ;;  %v309_v50 = vld [vmem:[%s2675_s30 + $0x50] sm:$0x1] }
  0x2b   : > { %v430_v56 = vsel %vm2728_vm3, %v425_v53, %v2722_v55  ;;  %v527_v6 = vshrl.u32 %v311_v51, 16  ;;  %v448_v7 = vor.u32 %v447_v30, %v2736_v0  ;;  %v458_v8 = vor.u32 %v457_v36, %v2759_v32  ;;  %v306_v0 = vld [vmem:[%s2675_s30 + $0x44] sm:$0x1] }
  0x2c   : > { %v440_v5 = vsel %vm2728_vm3, %v435_v59, %v439_v60  ;;  %v495_v11 = vrot.slane %v493_v49, 5  ;;  %v2807_v14 = vrot.slane %v499_v31, 5  ;;  %2387 = vmatprep.mubr.msk.bf16.mxu0 %vm786_vm0, %v2799_v4  ;;  %v461_v55 = vshll.u32 %v303_v63, 16  ;;  %v319_v63 = vld [vmem:[%s2675_s30 + $0x78] sm:$0xf] }
  0x2d   : > { %v2809_v15 = vcombine.low %v430_v56, %v440_v5  ;;  %v505_v16 = vrot.slane %v503_v58, 4  ;;  %v2813_v17 = vrot.slane %v514_v62, 4  ;;  %v449_v19 = vrot.slane %v448_v7, 4  ;;  %v320_v56 = vld [vmem:[%s2675_s30 + $0x7c] sm:$0xf] }
  0x2e   : > { %v459_v20 = vrot.slane %v458_v8, 4  ;;  %v2818_v18 = vrot.slane %v517_v1, 5  ;;  %v463_v21 = vrot.slane %v461_v55, 5  ;;  %v538_v25 = vshrl.u32 %v313_v9, 16 }
  0x2f   : > { %2312 = vmatmul.mubr.msk.bf16.gmra.mrb[4].mxu1 %vm786_vm0, %v2809_v15  ;;  %v2820_v27 = vcombine.low %v313_v9, %v314_v10  ;;  %v2822_v29 = vrot.slane %v523_v3, 5  ;;  %v529_v30 = vrot.slane %v527_v6, 4  ;;  %v454_v35 = vsel %vm2728_vm3, %v449_v19, %v2759_v32 }
  0x30   : > { %v472_v36 = vor.u32 %v2769_v22, %v2764_v37  ;;  %v464_v39 = vsel %vm2728_vm3, %v459_v20, %v463_v21  ;;  %v541_v40 = vshll.u32 %v313_v9, 16  ;;  %v482_v26 = vor.u32 %v481_v44, %v2774_v43 }
  0x31   : > { %2388 = vmatmul.mubr.msk.bf16.gmra.mrb[12].mxu0 %vm786_vm0, %v2820_v27  ;;  %v485_v41 = vshll.u32 %v306_v0, 16  ;;  %v2836_v46 = vcombine.low %v454_v35, %v464_v39  ;;  %v547_v47 = vshll.u32 %v314_v10, 16  ;;  %v551_v32 = vshrl.u32 %v314_v10, 16 }
  0x32   : > { %v473_v48 = vrot.slane %v472_v36, 4  ;;  %v2838_v37 = vrot.slane %v538_v25, 4  ;;  %v483_v22 = vrot.slane %v482_v26, 4  ;;  %v562_v2 = vshrl.u32 %v316_v38, 16  ;;  %v322_v25 = vld [vmem:[%s2675_s30 + $0x84] sm:$0xf] }
  0x33   : > { %v487_v49 = vrot.slane %v485_v41, 5  ;;  %2315 = vmatprep.mubr.msk.bf16.mxu1 %vm786_vm0, %v2836_v46  ;;  %v565_v51 = vshll.u32 %v316_v38, 16  ;;  %v571_v31 = vshll.u32 %v317_v45, 16  ;;  %v2846_v58 = vcombine.low %v316_v38, %v317_v45 }
  0x34   : > { %v478_v44 = vsel %vm2728_vm3, %v473_v48, %v2774_v43  ;;  %v575_v59 = vshrl.u32 %v317_v45, 16  ;;  %v496_v60 = vor.u32 %v495_v11, %v2791_v54  ;;  %v506_v62 = vor.u32 %v505_v16, %v2807_v14  ;;  %v312_v54 = vld [vmem:[%s2675_s30 + $0x5c] sm:$0x1]  ;;  %v315_v48 = vld [vmem:[%s2675_s30 + $0x68] sm:$0x1] }
  0x35   : > { %v488_v53 = vsel %vm2728_vm3, %v483_v22, %v487_v49  ;;  %v543_v1 = vrot.slane %v541_v40, 5  ;;  %v2854_v3 = vrot.slane %v547_v47, 5  ;;  %2391 = vmatprep.mubr.msk.bf16.mxu0 %vm786_vm0, %v2846_v58  ;;  %v509_v43 = vshll.u32 %v309_v50, 16  ;;  %v323_v40 = vld [vmem:[%s2675_s30 + $0x88] sm:$0xf] }
  0x36   : > { %v2856_v5 = vcombine.low %v478_v44, %v488_v53  ;;  %v553_v6 = vrot.slane %v551_v32, 4  ;;  %v2860_v7 = vrot.slane %v562_v2, 4  ;;  %v497_v8 = vrot.slane %v496_v60, 4  ;;  %v325_v53 = vld [vmem:[%s2675_s30 + $0x90] sm:$0xf] }
  0x37   : > { %v507_v9 = vrot.slane %v506_v62, 4  ;;  %v2865_v10 = vrot.slane %v565_v51, 5  ;;  %v511_v11 = vrot.slane %v509_v43, 5  ;;  %v586_v55 = vshrl.u32 %v319_v63, 16 }
  0x38   : > { %2316 = vmatmul.mubr.msk.bf16.gmra.mrb[8].mxu1 %vm786_vm0, %v2856_v5  ;;  %v2867_v16 = vcombine.low %v319_v63, %v320_v56  ;;  %v2869_v19 = vrot.slane %v571_v31, 5  ;;  %v577_v20 = vrot.slane %v575_v59, 4  ;;  %v502_v0 = vsel %vm2728_vm3, %v497_v8, %v2807_v14  ;;  %v326_v59 = vld [vmem:[%s2675_s30 + $0x94] sm:$0xf] }
  0x39   : > { %v520_v21 = vor.u32 %v2818_v18, %v2813_v17  ;;  %v512_v35 = vsel %vm2728_vm3, %v507_v9, %v511_v11  ;;  %v589_v36 = vshll.u32 %v319_v63, 16  ;;  %v530_v38 = vor.u32 %v529_v30, %v2822_v29 }
  0x3a   : > { %2392 = vmatmul.mubr.msk.bf16.gmra.mrb[16].mxu0 %vm786_vm0, %v2867_v16  ;;  %v533_v39 = vshll.u32 %v312_v54, 16  ;;  %v2883_v26 = vcombine.low %v502_v0, %v512_v35  ;;  %v595_v41 = vshll.u32 %v320_v56, 16  ;;  %v599_v14 = vshrl.u32 %v320_v56, 16  ;;  %v328_v35 = vld [vmem:[%s2675_s30 + $0x9c] sm:$0xf] }
  0x3b   : > { %v521_v45 = vrot.slane %v520_v21, 4  ;;  %v2885_v17 = vrot.slane %v586_v55, 4  ;;  %v531_v18 = vrot.slane %v530_v38, 4  ;;  %v610_v32 = vshrl.u32 %v322_v25, 16 }
  0x3c   : > { %v535_v47 = vrot.slane %v533_v39, 5  ;;  %2319 = vmatprep.mubr.msk.bf16.mxu1 %vm786_vm0, %v2883_v26  ;;  %v613_v22 = vshll.u32 %v322_v25, 16  ;;  %v619_v49 = vshll.u32 %v323_v40, 16  ;;  %v2893_v2 = vcombine.low %v322_v25, %v323_v40 }
  0x3d   : > { %v526_v30 = vsel %vm2728_vm3, %v521_v45, %v2822_v29  ;;  %v623_v44 = vshrl.u32 %v323_v40, 16  ;;  %v544_v51 = vor.u32 %v543_v1, %v2838_v37  ;;  %v554_v31 = vor.u32 %v553_v6, %v2854_v3  ;;  %v318_v37 = vld [vmem:[%s2675_s30 + $0x74] sm:$0x1] }
  0x3e   : > { %v536_v50 = vsel %vm2728_vm3, %v531_v18, %v535_v47  ;;  %v591_v60 = vrot.slane %v589_v36, 5  ;;  %v2901_v62 = vrot.slane %v595_v41, 5  ;;  %2395 = vmatprep.mubr.msk.bf16.mxu0 %vm786_vm0, %v2893_v2  ;;  %v557_v29 = vshll.u32 %v315_v48, 16  ;;  %v329_v41 = vld [vmem:[%s2675_s30 + $0xa0] sm:$0xf] }
  0x3f   : > { %v2903_v63 = vcombine.low %v526_v30, %v536_v50  ;;  %v601_v56 = vrot.slane %v599_v14, 4  ;;  %v2907_v43 = vrot.slane %v610_v32, 4  ;;  %v545_v8 = vrot.slane %v544_v51, 4  ;;  %v321_v48 = vld [vmem:[%s2675_s30 + $0x80] sm:$0x1] }
  0x40   : > { %v555_v9 = vrot.slane %v554_v31, 4  ;;  %v2912_v1 = vrot.slane %v613_v22, 5  ;;  %v559_v6 = vrot.slane %v557_v29, 5  ;;  %v634_v54 = vshrl.u32 %v325_v53, 16 }
  0x41   : > { %2320 = vmatmul.mubr.msk.bf16.gmra.mrb[12].mxu1 %vm786_vm0, %v2903_v63  ;;  %v2914_v11 = vcombine.low %v325_v53, %v326_v59  ;;  %v2916_v55 = vrot.slane %v619_v49, 5  ;;  %v2918_v0 = vrot.slane %v623_v44, 4  ;;  %v550_v21 = vsel %vm2728_vm3, %v545_v8, %v2854_v3 }
  0x42   : > { %v568_v25 = vor.u32 %v2865_v10, %v2860_v7  ;;  %v560_v36 = vsel %vm2728_vm3, %v555_v9, %v559_v6  ;;  %v637_v38 = vshll.u32 %v325_v53, 16  ;;  %v578_v39 = vor.u32 %v577_v20, %v2869_v19  ;;  %v331_v53 = vld [vmem:[%s2675_s30 + $0xa8] sm:$0xf] }
  0x43   : > { %2396 = vmatmul.mubr.msk.bf16.gmra.mrb[20].mxu0 %vm786_vm0, %v2914_v11  ;;  %v581_v40 = vshll.u32 %v318_v37, 16  ;;  %v2932_v14 = vcombine.low %v550_v21, %v560_v36  ;;  %v643_v45 = vshll.u32 %v326_v59, 16  ;;  %v647_v3 = vshrl.u32 %v326_v59, 16  ;;  %v332_v59 = vld [vmem:[%s2675_s30 + $0xac] sm:$0xf] }
  0x44   : > { %v569_v18 = vrot.slane %v568_v25, 4  ;;  %v2934_v7 = vrot.slane %v634_v54, 4  ;;  %v579_v10 = vrot.slane %v578_v39, 4  ;;  %v658_v32 = vshrl.u32 %v328_v35, 16 }
  0x45   : > { %v583_v47 = vrot.slane %v581_v40, 5  ;;  %2323 = vmatprep.mubr.msk.bf16.mxu1 %vm786_vm0, %v2932_v14  ;;  %v661_v30 = vshll.u32 %v328_v35, 16  ;;  %v667_v22 = vshll.u32 %v329_v41, 16  ;;  %v2942_v49 = vcombine.low %v328_v35, %v329_v41 }
  0x46   : > { %v574_v20 = vsel %vm2728_vm3, %v569_v18, %v2869_v19  ;;  %v671_v44 = vshrl.u32 %v329_v41, 16  ;;  %v592_v51 = vor.u32 %v591_v60, %v2885_v17  ;;  %v602_v31 = vor.u32 %v601_v56, %v2901_v62  ;;  %v324_v56 = vld [vmem:[%s2675_s30 + $0x8c] sm:$0x1]  ;;  %v334_v41 = vld [vmem:[%s2675_s30 + $0xb4] sm:$0xf] }
  0x47   : > { %v584_v50 = vsel %vm2728_vm3, %v579_v10, %v583_v47  ;;  %v639_v29 = vrot.slane %v637_v38, 5  ;;  %v2952_v8 = vrot.slane %v643_v45, 5  ;;  %2399 = vmatprep.mubr.msk.bf16.mxu0 %vm786_vm0, %v2942_v49  ;;  %v605_v9 = vshll.u32 %v321_v48, 16  ;;  %v335_v47 = vld [vmem:[%s2675_s30 + $0xb8] sm:$0xf] }
  0x48   : > { %v2954_v19 = vcombine.low %v574_v20, %v584_v50  ;;  %v649_v37 = vrot.slane %v647_v3, 4  ;;  %v2958_v6 = vrot.slane %v658_v32, 4  ;;  %v593_v17 = vrot.slane %v592_v51, 4  ;;  %v327_v32 = vld [vmem:[%s2675_s30 + $0x98] sm:$0x1] }
  0x49   : > { %v603_v60 = vrot.slane %v602_v31, 4  ;;  %v663_v54 = vrot.slane %v661_v30, 5  ;;  %v607_v21 = vrot.slane %v605_v9, 5  ;;  %v682_v25 = vshrl.u32 %v331_v53, 16  ;;  %v2992_v51 = vld [vmem:[%s2968_s8 + $0x4] sm:$0xf] }
  0x4a   : > { %2324 = vmatmul.mubr.msk.bf16.gmra.mrb[16].mxu1 %vm786_vm0, %v2954_v19  ;;  %v2963_v35 = vcombine.low %v331_v53, %v332_v59  ;;  %v2970_v36 = vrot.slane %v667_v22, 5  ;;  %v673_v38 = vrot.slane %v671_v44, 4  ;;  %v598_v39 = vsel %vm2728_vm3, %v593_v17, %v2901_v62 }
  0x4b   : > { %v616_v40 = vor.u32 %v2912_v1, %v2907_v43  ;;  %v608_v45 = vsel %vm2728_vm3, %v603_v60, %v607_v21  ;;  %v685_v3 = vshll.u32 %v331_v53, 16  ;;  %v626_v18 = vor.u32 %v2918_v0, %v2916_v55  ;;  %v2989_v1 = vld [vmem:[%s2968_s8] sm:$0xf] }
  0x4c   : > { %2400 = vmatmul.mubr.msk.bf16.gmra.mrb[24].mxu0 %vm786_vm0, %v2963_v35  ;;  %v629_v10 = vshll.u32 %v324_v56, 16  ;;  %v2986_v48 = vcombine.low %v598_v39, %v608_v45  ;;  %v691_v62 = vshll.u32 %v332_v59, 16  ;;  %v695_v20 = vshrl.u32 %v332_v59, 16 }
  0x4d   : > { %v617_v43 = vrot.slane %v616_v40, 4  ;;  %v684_v30 = vrot.slane %v682_v25, 4  ;;  %v627_v22 = vrot.slane %v626_v18, 4  ;;  %v706_v44 = vshrl.u32 %v334_v41, 16 }
  0x4e   : > { %v631_v50 = vrot.slane %v629_v10, 5  ;;  %2327 = vmatprep.mubr.msk.bf16.mxu1 %vm786_vm0, %v2986_v48  ;;  %v709_v31 = vshll.u32 %v334_v41, 16  ;;  %v715_v53 = vshll.u32 %v335_v47, 16  ;;  %v2999_v59 = vcombine.low %v334_v41, %v335_v47  ;;  %v330_v10 = vld [vmem:[%s2675_s30 + $0xa4] sm:$0x1] }
  0x4f   : > { %v622_v0 = vsel %vm2728_vm3, %v617_v43, %v2916_v55  ;;  %v719_v17 = vshrl.u32 %v335_v47, 16  ;;  %v640_v60 = vor.u32 %v639_v29, %v2934_v7  ;;  %v650_v56 = vor.u32 %v649_v37, %v2952_v8 }
  0x50   : > { %v632_v9 = vsel %vm2728_vm3, %v627_v22, %v631_v50  ;;  %v687_v21 = vrot.slane %v685_v3, 5  ;;  %2403 = vmatprep.mubr.msk.bf16.mxu0 %vm786_vm0, %v2999_v59  ;;  %v653_v55 = vshll.u32 %v327_v32, 16  ;;  %v2129_v39 = vcombine.low %v2989_v1, %v2992_v51 }
  0x51   : > { %v3005_v25 = vcombine.low %v622_v0, %v632_v9  ;;  %v693_v40 = vrot.slane %v691_v62, 5  ;;  %v697_v41 = vrot.slane %v695_v20, 4  ;;  %v641_v45 = vrot.slane %v640_v60, 4  ;;  %v333_v20 = vld [vmem:[%s2675_s30 + $0xb0] sm:$0x1] }
  0x52   : > { %v651_v18 = vrot.slane %v650_v56, 4  ;;  %v708_v7 = vrot.slane %v706_v44, 4  ;;  %v711_v29 = vrot.slane %v709_v31, 5  ;;  %v655_v37 = vrot.slane %v653_v55, 5 }
  0x53   : > { %2328 = vmatmul.mubr.msk.bf16.gmra.mrb[20].mxu1 %vm786_vm0, %v3005_v25  ;;  %v664_v3 = vor.u32 %v663_v54, %v2958_v6  ;;  %v717_v47 = vrot.slane %v715_v53, 5  ;;  %v721_v32 = vrot.slane %v719_v17, 4  ;;  %v646_v43 = vsel %vm2728_vm3, %v641_v45, %v2952_v8  ;;  %v336_v6 = vld [vmem:[%s2675_s30 + $0xbc] sm:$0x1] }
  0x54   : > { %2404 = vmatmul.mubr.msk.bf16.gmra.mrb[28].mxu0 %vm786_vm0, %v2129_v39  ;;  %v674_v62 = vor.u32 %v673_v38, %v2970_v36  ;;  %v656_v22 = vsel %vm2728_vm3, %v651_v18, %v655_v37  ;;  %v677_v44 = vshll.u32 %v330_v10, 16  ;;  %v688_v31 = vor.u32 %v687_v21, %v684_v30 }
  0x55   : > { %v665_v50 = vrot.slane %v664_v3, 4  ;;  %2409 = vmatprep.mubr.msk.bf16.mxu0 %vm786_vm0, %v2761_v34  ;;  %v2073_v54 = vcombine.low %v646_v43, %v656_v22  ;;  %v698_v53 = vor.u32 %v697_v41, %v693_v40  ;;  %v701_v38 = vshll.u32 %v333_v20, 16 }
  0x56   : > { %v675_v0 = vrot.slane %v674_v62, 4  ;;  %v679_v9 = vrot.slane %v677_v44, 5  ;;  %v712_v17 = vor.u32 %v711_v29, %v708_v7  ;;  %v689_v60 = vrot.slane %v688_v31, 4 }
  0x57   : > { %v670_v8 = vsel %vm2728_vm3, %v665_v50, %v2970_v36  ;;  %2331 = vmatprep.mubr.msk.bf16.mxu1 %vm786_vm0, %v2073_v54  ;;  %v699_v56 = vrot.slane %v698_v53, 4  ;;  %v722_v55 = vor.u32 %v721_v32, %v717_v47  ;;  %v725_v39 = vshll.u32 %v336_v6, 16 }
  0x58   : > { %v680_v34 = vsel %vm2728_vm3, %v675_v0, %v679_v9  ;;  %v703_v45 = vrot.slane %v701_v38, 5  ;;  %v713_v18 = vrot.slane %v712_v17, 4  ;;  %v2094_v30 = vcombine.low %v2694_v24, %v2699_v28 }
  0x59   : > { %v2074_v21 = vcombine.low %v670_v8, %v680_v34  ;;  %v694_v36 = vsel %vm2728_vm3, %v689_v60, %v693_v40  ;;  %v723_v41 = vrot.slane %v722_v55, 4  ;;  %v727_v10 = vrot.slane %v725_v39, 5 }
  0x5a   : > { %v704_v7 = vsel %vm2728_vm3, %v699_v56, %v703_v45  ;;  %v718_v37 = vsel %vm2728_vm3, %v713_v18, %v717_v47 }
  0x5b   : > { %2332 = vmatmul.mubr.msk.bf16.gmra.mrb[24].mxu1 %vm786_vm0, %v2074_v21  ;;  %v2075_v29 = vcombine.low %v694_v36, %v704_v7  ;;  %v728_v24 = vsel %vm2728_vm3, %v723_v41, %v727_v10 }
  0x5c   : > { %2410 = vmatmul.mubr.msk.bf16.vlgmr.msra.gmra.mrb[0].mxu0 %vm786_vm0, %v2789_v52  ;;  %v2076_v28 = vcombine.low %v718_v37, %v728_v24  ;;  %v1515_v52 = vshrl.u32 %v2992_v51, 16 }
  0x5d   : > { %2413 = vmatprep.mubr.msk.bf16.mxu0 %vm786_vm0, %v2809_v15  ;;  %2335 = vmatprep.mubr.msk.bf16.mxu1 %vm786_vm0, %v2075_v29 }
  0x63   : > { %2336 = vmatmul.mubr.msk.bf16.gmra.mrb[28].mxu1 %vm786_vm0, %v2076_v28 }
  0x64   : > { %2414 = vmatmul.mubr.msk.bf16.gmra.mrb[4].mxu0 %vm786_vm0, %v2836_v46  ;;  %2341 = vmatprep.mubr.msk.bf16.mxu1 %vm786_vm0, %v2094_v30  ;;  %v1517_v46 = vrot.slane %v1515_v52, 4 }
  0x65   : > { %2417 = vmatprep.mubr.msk.bf16.mxu0 %vm786_vm0, %v2856_v5  ;;  %v339_v5 = vld [vmem:[%s2968_s8 + $0x8] sm:$0x1] }
  0x6b   : > { %2342 = vmatmul.mubr.msk.bf16.vlgmr.msra.gmra.mrb[0].mxu1 %vm786_vm0, %v2681_v12  ;;  %v1502_v12 = vshrl.u32 %v2989_v1, 16 }
  0x6c   : > { %2418 = vmatmul.mubr.msk.bf16.gmra.mrb[8].mxu0 %vm786_vm0, %v2883_v26  ;;  %2345 = vmatprep.mubr.msk.bf16.mxu1 %vm786_vm0, %v2691_v23  ;;  %v1505_v23 = vshll.u32 %v2989_v1, 16 }
  0x6d   : > { %2421 = vmatprep.mubr.msk.bf16.mxu0 %vm786_vm0, %v2903_v63  ;;  %v1521_v63 = vshll.u32 %v339_v5, 16 }
  0x6e   : > { %v1507_v15 = vrot.slane %v1505_v23, 5 }
  0x73   : > { %2346 = vmatmul.mubr.msk.bf16.gmra.mrb[4].mxu1 %vm786_vm0, %v2707_v33  ;;  %v1511_v33 = vshll.u32 %v2992_v51, 16 }
  0x74   : > { %2422 = vmatmul.mubr.msk.bf16.gmra.mrb[12].mxu0 %vm786_vm0, %v2932_v14  ;;  %2349 = vmatprep.mubr.msk.bf16.mxu1 %vm786_vm0, %v2732_v61  ;;  %v1504_v61 = vrot.slane %v1502_v12, 4 }
  0x75   : > { %2425 = vmatprep.mubr.msk.bf16.mxu0 %vm786_vm0, %v2954_v19 }
  0x76   : > { %v1508_v26 = vor.u32 %v1507_v15, %v1504_v61 }
  0x78   : > { %v1509_v14 = vrot.slane %v1508_v26, 4 }
  0x7b   : > { %2350 = vmatmul.mubr.msk.bf16.gmra.mrb[8].mxu1 %vm786_vm0, %v2743_v13  ;;  %v1513_v13 = vrot.slane %v1511_v33, 5 }
  0x7c   : > { %2426 = vmatmul.mubr.msk.bf16.gmra.mrb[16].mxu0 %vm786_vm0, %v2986_v48  ;;  %2353 = vmatprep.mubr.msk.bf16.mxu1 %vm786_vm0, %v2771_v42  ;;  %v1523_v48 = vrot.slane %v1521_v63, 5 }
  0x7d   : > { %2429 = vmatprep.mubr.msk.bf16.mxu0 %vm786_vm0, %v3005_v25  ;;  %v1518_v42 = vor.u32 %v1517_v46, %v1513_v13 }
  0x7f   : > { %v1519_v19 = vrot.slane %v1518_v42, 4 }
  0x83   : > { %2354 = vmatmul.mubr.msk.bf16.gmra.mrb[12].mxu1 %vm786_vm0, %v2799_v4  ;;  %v1514_v4 = vsel %vm2728_vm3, %v1509_v14, %v1513_v13 }
  0x84   : > { %2430 = vmatmul.mubr.msk.bf16.gmra.mrb[20].mxu0 %vm786_vm0, %v2073_v54  ;;  %2357 = vmatprep.mubr.msk.bf16.mxu1 %vm786_vm0, %v2820_v27  ;;  %v1524_v27 = vsel %vm2728_vm3, %v1519_v19, %v1523_v48 }
  0x85   : > { %2433 = vmatprep.mubr.msk.bf16.mxu0 %vm786_vm0, %v2074_v21  ;;  %v2149_v1 = vcombine.low %v1514_v4, %v1524_v27 }
  0x8b   : > { %2358 = vmatmul.mubr.msk.bf16.gmra.mrb[16].mxu1 %vm786_vm0, %v2846_v58 }
  0x8c   : > { %2434 = vmatmul.mubr.msk.bf16.gmra.mrb[24].mxu0 %vm786_vm0, %v2075_v29  ;;  %2361 = vmatprep.mubr.msk.bf16.mxu1 %vm786_vm0, %v2867_v16 }
  0x8d   : > { %2437 = vmatprep.mubr.msk.bf16.mxu0 %vm786_vm0, %v2076_v28 }
  0x93   : > { %2362 = vmatmul.mubr.msk.bf16.gmra.mrb[20].mxu1 %vm786_vm0, %v2893_v2 }
  0x94   : > { %2438 = vmatmul.mubr.msk.bf16.gmra.mrb[28].mxu0 %vm786_vm0, %v2149_v1  ;;  %2365 = vmatprep.mubr.msk.bf16.mxu1 %vm786_vm0, %v2914_v11  ;;  %v3113_v11 = vld [vmem:[%s3229_s3] ss:$0 sm:$0xff] }
  0x9b   : > { %2366 = vmatmul.mubr.msk.bf16.gmra.mrb[24].mxu1 %vm786_vm0, %v2942_v49 }
  0x9c   : > { %2369 = vmatprep.mubr.msk.bf16.mxu1 %vm786_vm0, %v2963_v35 }
  0xa3   : > { %2370 = vmatmul.mubr.msk.bf16.gmra.mrb[28].mxu1 %vm786_vm0, %v2999_v59 }
 0x12f   : > { %v2411_v57 = vpop.f32.mrb[0].mxu0 }
 0x130   : > { %v1574_v58 = vpop.f32.mrb[1].mxu0 }
 0x131   : > { %v2412_v16 = vpop.f32.mrb[2].mxu0 }
 0x132   : > { %v1577_v51 = vpop.f32.mrb[3].mxu0 }
 0x137   : > { %v2415_v2 = vpop.f32.mrb[4].mxu0 }
 0x138   : > { %v1590_v25 = vpop.f32.mrb[5].mxu0 }
 0x139   : > { %v2416_v40 = vpop.f32.mrb[6].mxu0 }
 0x13a   : > { %v1593_v3 = vpop.f32.mrb[7].mxu0 }
 0x13e   : > { %v2343_v47 = vpop.f32.mrb[0].mxu1 }
 0x13f   : > { %v2419_v49 = vpop.f32.mrb[8].mxu0  ;;  %v2441_v35 = vadd.f32 %v2411_v57, %v2343_v47  ;;  %v1164_v32 = vpop.f32.mrb[1].mxu1 }
 0x140   : > { %v1606_v43 = vpop.f32.mrb[9].mxu0  ;;  %v2442_v59 = vadd.f32 %v1574_v58, %v1164_v32  ;;  %v2344_v62 = vpop.f32.mrb[2].mxu1 }
 0x141   : > { %v2420_v20 = vpop.f32.mrb[10].mxu0  ;;  %v1742_v22 = vadd.f32 %v2441_v35, %v3113_v11  ;;  %v2443_v50 = vadd.f32 %v2412_v16, %v2344_v62  ;;  %v1167_v44 = vpop.f32.mrb[3].mxu1 }
 0x142   : > { %v1609_v6 = vpop.f32.mrb[11].mxu0  ;;  %v1740_v54 = vadd.f32 %v2442_v59, %v3113_v11  ;;  %v2444_v0 = vadd.f32 %v1577_v51, %v1167_v44 }
 0x143   : > { %v2207_v31 = vpack.c.bf16 %v1742_v22, %v1742_v22  ;;  %v1743_v53 = vadd.f32 %v2443_v50, %v3113_v11 }
 0x144   : > { %v2205_v8 = vpack.c.bf16 %v1740_v54, %v1740_v54  ;;  %v1741_v9 = vadd.f32 %v2444_v0, %v3113_v11 }
 0x145   : > { %1903 = vst.msk [vmem:[%s3120_s14 + $0x8] sm:$0xf] %vm1900_vm4, %v2207_v31  ;;  %v2208_v38 = vpack.c.bf16 %v1743_v53, %v1743_v53 }
 0x146   : > { %1901 = vst.msk [vmem:[%s3120_s14] sm:$0xf] %vm1900_vm4, %v2205_v8  ;;  %v2206_v17 = vpack.c.bf16 %v1741_v9, %v1741_v9  ;;  %v2347_v60 = vpop.f32.mrb[4].mxu1 }
 0x147   : > { %v2423_v56 = vpop.f32.mrb[12].mxu0  ;;  %1904 = vst.msk [vmem:[%s3120_s14 + $0xc] sm:$0xf] %vm1900_vm4, %v2208_v38  ;;  %v2445_v55 = vadd.f32 %v2415_v2, %v2347_v60  ;;  %v1180_v39 = vpop.f32.mrb[5].mxu1 }
 0x148   : > { %v1622_v34 = vpop.f32.mrb[13].mxu0  ;;  %1902 = vst.msk [vmem:[%s3120_s14 + $0x4] sm:$0xf] %vm1900_vm4, %v2206_v17  ;;  %v2446_v45 = vadd.f32 %v1590_v25, %v1180_v39  ;;  %v2348_v18 = vpop.f32.mrb[6].mxu1 }
 0x149   : > { %v2424_v30 = vpop.f32.mrb[14].mxu0  ;;  %v1746_v21 = vadd.f32 %v2445_v55, %v3113_v11  ;;  %v2447_v36 = vadd.f32 %v2416_v40, %v2348_v18  ;;  %v1183_v41 = vpop.f32.mrb[7].mxu1 }
 0x14a   : > { %v1625_v10 = vpop.f32.mrb[15].mxu0  ;;  %v1744_v7 = vadd.f32 %v2446_v45, %v3113_v11  ;;  %v2448_v29 = vadd.f32 %v1593_v3, %v1183_v41 }
 0x14b   : > { %v2211_v37 = vpack.c.bf16 %v1746_v21, %v1746_v21  ;;  %v1747_v24 = vadd.f32 %v2447_v36, %v3113_v11 }
 0x14c   : > { %v2209_v28 = vpack.c.bf16 %v1744_v7, %v1744_v7  ;;  %v1745_v12 = vadd.f32 %v2448_v29, %v3113_v11 }
 0x14d   : > { %1907 = vst.msk [vmem:[%s3120_s14 + $0x18] sm:$0xf] %vm1900_vm4, %v2211_v37  ;;  %v2212_v23 = vpack.c.bf16 %v1747_v24, %v1747_v24 }
 0x14e   : > { %1905 = vst.msk [vmem:[%s3120_s14 + $0x10] sm:$0xf] %vm1900_vm4, %v2209_v28  ;;  %v2210_v33 = vpack.c.bf16 %v1745_v12, %v1745_v12  ;;  %v2351_v52 = vpop.f32.mrb[8].mxu1 }
 0x14f   : > { %v2427_v61 = vpop.f32.mrb[16].mxu0  ;;  %1908 = vst.msk [vmem:[%s3120_s14 + $0x1c] sm:$0xf] %vm1900_vm4, %v2212_v23  ;;  %v2449_v15 = vadd.f32 %v2419_v49, %v2351_v52  ;;  %v1196_v13 = vpop.f32.mrb[9].mxu1 }
 0x150   : > { %v1638_v46 = vpop.f32.mrb[17].mxu0  ;;  %1906 = vst.msk [vmem:[%s3120_s14 + $0x14] sm:$0xf] %vm1900_vm4, %v2210_v33  ;;  %v2450_v5 = vadd.f32 %v1606_v43, %v1196_v13  ;;  %v2352_v26 = vpop.f32.mrb[10].mxu1 }
 0x151   : > { %v2428_v42 = vpop.f32.mrb[18].mxu0  ;;  %v1750_v63 = vadd.f32 %v2449_v15, %v3113_v11  ;;  %v2451_v14 = vadd.f32 %v2420_v20, %v2352_v26  ;;  %v1199_v19 = vpop.f32.mrb[11].mxu1 }
 0x152   : > { %v1641_v48 = vpop.f32.mrb[19].mxu0  ;;  %v1748_v4 = vadd.f32 %v2450_v5, %v3113_v11  ;;  %v2452_v27 = vadd.f32 %v1609_v6, %v1199_v19 }
 0x153   : > { %v2215_v1 = vpack.c.bf16 %v1750_v63, %v1750_v63  ;;  %v1751_v57 = vadd.f32 %v2451_v14, %v3113_v11 }
 0x154   : > { %v2213_v58 = vpack.c.bf16 %v1748_v4, %v1748_v4  ;;  %v1749_v16 = vadd.f32 %v2452_v27, %v3113_v11 }
 0x155   : > { %1911 = vst.msk [vmem:[%s3120_s14 + $0x28] sm:$0xf] %vm1900_vm4, %v2215_v1  ;;  %v2216_v51 = vpack.c.bf16 %v1751_v57, %v1751_v57 }
 0x156   : > { %1909 = vst.msk [vmem:[%s3120_s14 + $0x20] sm:$0xf] %vm1900_vm4, %v2213_v58  ;;  %v2214_v2 = vpack.c.bf16 %v1749_v16, %v1749_v16  ;;  %v2355_v25 = vpop.f32.mrb[12].mxu1 }
 0x157   : > { %v2431_v40 = vpop.f32.mrb[20].mxu0  ;;  %1912 = vst.msk [vmem:[%s3120_s14 + $0x2c] sm:$0xf] %vm1900_vm4, %v2216_v51  ;;  %v2453_v3 = vadd.f32 %v2423_v56, %v2355_v25  ;;  %v1212_v47 = vpop.f32.mrb[13].mxu1 }
 0x158   : > { %v1654_v49 = vpop.f32.mrb[21].mxu0  ;;  %1910 = vst.msk [vmem:[%s3120_s14 + $0x24] sm:$0xf] %vm1900_vm4, %v2214_v2  ;;  %v2454_v35 = vadd.f32 %v1622_v34, %v1212_v47  ;;  %v2356_v32 = vpop.f32.mrb[14].mxu1 }
 0x159   : > { %v2432_v43 = vpop.f32.mrb[22].mxu0  ;;  %v1754_v59 = vadd.f32 %v2453_v3, %v3113_v11  ;;  %v2455_v62 = vadd.f32 %v2424_v30, %v2356_v32  ;;  %v1215_v20 = vpop.f32.mrb[15].mxu1 }
 0x15a   : > { %v1657_v22 = vpop.f32.mrb[23].mxu0  ;;  %v1752_v50 = vadd.f32 %v2454_v35, %v3113_v11  ;;  %v2456_v44 = vadd.f32 %v1625_v10, %v1215_v20 }
 0x15b   : > { %v2219_v6 = vpack.c.bf16 %v1754_v59, %v1754_v59  ;;  %v1755_v54 = vadd.f32 %v2455_v62, %v3113_v11 }
 0x15c   : > { %v2217_v0 = vpack.c.bf16 %v1752_v50, %v1752_v50  ;;  %v1753_v31 = vadd.f32 %v2456_v44, %v3113_v11 }
 0x15d   : > { %1915 = vst.msk [vmem:[%s3120_s14 + $0x38] sm:$0xf] %vm1900_vm4, %v2219_v6  ;;  %v2220_v53 = vpack.c.bf16 %v1755_v54, %v1755_v54 }
 0x15e   : > { %1913 = vst.msk [vmem:[%s3120_s14 + $0x30] sm:$0xf] %vm1900_vm4, %v2217_v0  ;;  %v2218_v8 = vpack.c.bf16 %v1753_v31, %v1753_v31  ;;  %v2359_v9 = vpop.f32.mrb[16].mxu1 }
 0x15f   : > { %v2435_v38 = vpop.f32.mrb[24].mxu0  ;;  %1916 = vst.msk [vmem:[%s3120_s14 + $0x3c] sm:$0xf] %vm1900_vm4, %v2220_v53  ;;  %v2457_v17 = vadd.f32 %v2427_v61, %v2359_v9  ;;  %v1228_v60 = vpop.f32.mrb[17].mxu1 }
 0x160   : > { %v1670_v56 = vpop.f32.mrb[25].mxu0  ;;  %1914 = vst.msk [vmem:[%s3120_s14 + $0x34] sm:$0xf] %vm1900_vm4, %v2218_v8  ;;  %v2458_v55 = vadd.f32 %v1638_v46, %v1228_v60  ;;  %v2360_v39 = vpop.f32.mrb[18].mxu1 }
 0x161   : > { %v2436_v34 = vpop.f32.mrb[26].mxu0  ;;  %v1758_v45 = vadd.f32 %v2457_v17, %v3113_v11  ;;  %v2459_v18 = vadd.f32 %v2428_v42, %v2360_v39  ;;  %v1231_v30 = vpop.f32.mrb[19].mxu1 }
 0x162   : > { %v1673_v21 = vpop.f32.mrb[27].mxu0  ;;  %v1756_v36 = vadd.f32 %v2458_v55, %v3113_v11  ;;  %v2460_v41 = vadd.f32 %v1641_v48, %v1231_v30 }
 0x163   : > { %v2223_v10 = vpack.c.bf16 %v1758_v45, %v1758_v45  ;;  %v1759_v7 = vadd.f32 %v2459_v18, %v3113_v11 }
 0x164   : > { %v2221_v29 = vpack.c.bf16 %v1756_v36, %v1756_v36  ;;  %v1757_v37 = vadd.f32 %v2460_v41, %v3113_v11 }
 0x165   : > { %1919 = vst.msk [vmem:[%s3120_s14 + $0x48] sm:$0xf] %vm1900_vm4, %v2223_v10  ;;  %v2224_v24 = vpack.c.bf16 %v1759_v7, %v1759_v7 }
 0x166   : > { %1917 = vst.msk [vmem:[%s3120_s14 + $0x40] sm:$0xf] %vm1900_vm4, %v2221_v29  ;;  %v2222_v28 = vpack.c.bf16 %v1757_v37, %v1757_v37  ;;  %v2363_v12 = vpop.f32.mrb[20].mxu1 }
 0x167   : > { %v2439_v23 = vpop.f32.mrb[28].mxu0  ;;  %1920 = vst.msk [vmem:[%s3120_s14 + $0x4c] sm:$0xf] %vm1900_vm4, %v2224_v24  ;;  %v2461_v33 = vadd.f32 %v2431_v40, %v2363_v12  ;;  %v1244_v52 = vpop.f32.mrb[21].mxu1 }
 0x168   : > { %v1686_v61 = vpop.f32.mrb[29].mxu0  ;;  %1918 = vst.msk [vmem:[%s3120_s14 + $0x44] sm:$0xf] %vm1900_vm4, %v2222_v28  ;;  %v2462_v15 = vadd.f32 %v1654_v49, %v1244_v52  ;;  %v2364_v13 = vpop.f32.mrb[22].mxu1 }
 0x169   : > { %v2440_v46 = vpop.f32.mrb[30].mxu0  ;;  %v1762_v5 = vadd.f32 %v2461_v33, %v3113_v11  ;;  %v2463_v26 = vadd.f32 %v2432_v43, %v2364_v13  ;;  %v1247_v42 = vpop.f32.mrb[23].mxu1 }
 0x16a   : > { %v1689_v63 = vpop.f32.mrb[31].mxu0  ;;  %v1760_v14 = vadd.f32 %v2462_v15, %v3113_v11  ;;  %v2464_v19 = vadd.f32 %v1657_v22, %v1247_v42 }
 0x16b   : > { %v2227_v48 = vpack.c.bf16 %v1762_v5, %v1762_v5  ;;  %v1763_v4 = vadd.f32 %v2463_v26, %v3113_v11 }
 0x16c   : > { %v2225_v27 = vpack.c.bf16 %v1760_v14, %v1760_v14  ;;  %v1761_v1 = vadd.f32 %v2464_v19, %v3113_v11 }
 0x16d   : > { %1923 = vst.msk [vmem:[%s3120_s14 + $0x58] sm:$0xf] %vm1900_vm4, %v2227_v48  ;;  %v2228_v57 = vpack.c.bf16 %v1763_v4, %v1763_v4 }
 0x16e   : > { %1921 = vst.msk [vmem:[%s3120_s14 + $0x50] sm:$0xf] %vm1900_vm4, %v2225_v27  ;;  %v2226_v58 = vpack.c.bf16 %v1761_v1, %v1761_v1  ;;  %v2367_v16 = vpop.f32.mrb[24].mxu1 }
 0x16f   : > { %1924 = vst.msk [vmem:[%s3120_s14 + $0x5c] sm:$0xf] %vm1900_vm4, %v2228_v57  ;;  %v2465_v51 = vadd.f32 %v2435_v38, %v2367_v16  ;;  %v1260_v2 = vpop.f32.mrb[25].mxu1 }
 0x170   : > { %1922 = vst.msk [vmem:[%s3120_s14 + $0x54] sm:$0xf] %vm1900_vm4, %v2226_v58  ;;  %v2466_v25 = vadd.f32 %v1670_v56, %v1260_v2  ;;  %v2368_v40 = vpop.f32.mrb[26].mxu1 }
 0x171   : > { %v1766_v3 = vadd.f32 %v2465_v51, %v3113_v11  ;;  %v2467_v47 = vadd.f32 %v2436_v34, %v2368_v40  ;;  %v1263_v49 = vpop.f32.mrb[27].mxu1 }
 0x172   : > { %v1764_v35 = vadd.f32 %v2466_v25, %v3113_v11  ;;  %v2468_v32 = vadd.f32 %v1673_v21, %v1263_v49 }
 0x173   : > { %v2231_v43 = vpack.c.bf16 %v1766_v3, %v1766_v3  ;;  %v1767_v59 = vadd.f32 %v2467_v47, %v3113_v11 }
 0x174   : > { %v2229_v62 = vpack.c.bf16 %v1764_v35, %v1764_v35  ;;  %v1765_v20 = vadd.f32 %v2468_v32, %v3113_v11 }
 0x175   : > { %1927 = vst.msk [vmem:[%s3120_s14 + $0x68] sm:$0xf] %vm1900_vm4, %v2231_v43  ;;  %v2232_v22 = vpack.c.bf16 %v1767_v59, %v1767_v59 }
 0x176   : > { %1925 = vst.msk [vmem:[%s3120_s14 + $0x60] sm:$0xf] %vm1900_vm4, %v2229_v62  ;;  %v2230_v50 = vpack.c.bf16 %v1765_v20, %v1765_v20  ;;  %v2371_v44 = vpop.f32.mrb[28].mxu1 }
 0x177   : > { %1928 = vst.msk [vmem:[%s3120_s14 + $0x6c] sm:$0xf] %vm1900_vm4, %v2232_v22  ;;  %v2469_v6 = vadd.f32 %v2439_v23, %v2371_v44  ;;  %v1276_v54 = vpop.f32.mrb[29].mxu1 }
 0x178   : > { %1926 = vst.msk [vmem:[%s3120_s14 + $0x64] sm:$0xf] %vm1900_vm4, %v2230_v50  ;;  %v2470_v0 = vadd.f32 %v1686_v61, %v1276_v54  ;;  %v2372_v31 = vpop.f32.mrb[30].mxu1 }
 0x179   : > { %v1770_v53 = vadd.f32 %v2469_v6, %v3113_v11  ;;  %v2471_v8 = vadd.f32 %v2440_v46, %v2372_v31  ;;  %v1279_v9 = vpop.f32.mrb[31].mxu1 }
 0x17a   : > { %v1768_v38 = vadd.f32 %v2470_v0, %v3113_v11  ;;  %v2472_v17 = vadd.f32 %v1689_v63, %v1279_v9 }
 0x17b   : > { %v2235_v60 = vpack.c.bf16 %v1770_v53, %v1770_v53  ;;  %v1771_v56 = vadd.f32 %v2471_v8, %v3113_v11 }
 0x17c   : > { %v2233_v55 = vpack.c.bf16 %v1768_v38, %v1768_v38  ;;  %v1769_v39 = vadd.f32 %v2472_v17, %v3113_v11 }
 0x17d   : > { %1931 = vst.msk [vmem:[%s3120_s14 + $0x78] sm:$0xf] %vm1900_vm4, %v2235_v60  ;;  %v2236_v34 = vpack.c.bf16 %v1771_v56, %v1771_v56 }
 0x17e   : > { %1929 = vst.msk [vmem:[%s3120_s14 + $0x70] sm:$0xf] %vm1900_vm4, %v2233_v55  ;;  %v2234_v45 = vpack.c.bf16 %v1769_v39, %v1769_v39 }
 0x17f   : > { %1932 = vst.msk [vmem:[%s3120_s14 + $0x7c] sm:$0xf] %vm1900_vm4, %v2236_v34 }
 0x180   : > { %1930 = vst.msk [vmem:[%s3120_s14 + $0x74] sm:$0xf] %vm1900_vm4, %v2234_v45 }
 0x181 PF: > { %s14_s17 = sadd.s32 1, %s2607_s17   ;;  %s3233_s15 = smov %s2603_s16 }
 0x182   : > { %p11_p5 = scmp.ge.s32.totalorder %s14_s17, 4   ;;  %s3234_s16 = smov %s3236_s18 }
 0x184   :  { %13 = sbr.rel (!%p11_p5) target bundleno = 2 (0x2), region = 72 }

</bundles_post_ra>
